<compile_context>
chip_gen: v6e
topology: v6e:2x2x1
jax: 0.10.0
libtpu: 0.0.40
codegen_flags: <defaults>
</compile_context>

<pallas_src>
import jax
import jax.numpy as jnp
from jax.experimental import pallas as pl
from jax.experimental.pallas import tpu as pltpu

LATENT_DIM = 16
LANE = 128                       # TPU lane width (VMEM footprint rounding)
ROW_ALIGN = 8                    # f32 sublane packing for the batch tile
MAX_TB = 4096                    # max rows per batch tile
TARGET_STEPS = 8                 # aim for >= 8 grid steps (megacore + pipelining)
VMEM_BUDGET = 32 * 1024 * 1024   # tile-selection budget (headroom on v7x)
VMEM_LIMIT = 48 * 1024 * 1024    # scoped VMEM limit (< v7x's 64 MiB physical)


def _round_up(n, m):
    return ((n + m - 1) // m) * m


def _cdiv(a, b):
    return -(-a // b)


def mlp_kernel(x_ref, w1_ref, b1_ref, w2_ref, b2_ref, w3_ref, b3_ref, out_ref):
    # features: Linear -> ReLU -> Linear(->16) -> ReLU   (all f32, MXU f32 acc)
    h1 = jnp.dot(x_ref[...], w1_ref[...], preferred_element_type=jnp.float32)
    h1 = jnp.maximum(h1 + b1_ref[...], 0.0)
    h2 = jnp.dot(h1, w2_ref[...], preferred_element_type=jnp.float32)
    h2 = jnp.maximum(h2 + b2_ref[...], 0.0)
    # top_layer: Linear(latent_dim, num_classes)
    y = jnp.dot(h2, w3_ref[...], preferred_element_type=jnp.float32)
    out_ref[...] = (y + b3_ref[...]).astype(out_ref.dtype)


def _choose_tb(B, in_dim, hidden, num_classes):
    """Pick the batch tile from a VMEM budget + a minimum-grid-steps target."""
    lane_in = _round_up(in_dim, LANE)
    lane_h = _round_up(hidden, LANE)
    lane_nc = _round_up(num_classes, LANE)
    # Per-row VMEM bytes while a tile is in flight (f32, lane-padded):
    #   x tile (double-buffered) + out tile (double-buffered) + h1/h2 values.
    per_row = 4 * (2 * lane_in + 2 * lane_nc + lane_h + LANE)
    # Resident weights/biases (double-buffered by default; they are tiny).
    weights = 4 * 2 * (in_dim * lane_h + hidden * LANE + LATENT_DIM * lane_nc
                       + lane_h + LANE + lane_nc)
    tb_budget = max(ROW_ALIGN, (VMEM_BUDGET - weights) // per_row)
    tb_budget = (tb_budget // ROW_ALIGN) * ROW_ALIGN
    # Keep >= TARGET_STEPS grid steps when B is large enough (v7x: 2 TCs,
    # plus DMA/compute overlap); small B collapses to a single block.
    tb_steps = _round_up(max(1, _cdiv(B, TARGET_STEPS)), ROW_ALIGN)
    return max(ROW_ALIGN, min(MAX_TB, tb_budget, tb_steps))


def mlp_forward(x, params):
    """x: (B, in_dim) float32. params: dict of pre-transposed f32 weights/biases."""
    w1, b1 = params["w1"], params["b1"]
    w2, b2 = params["w2"], params["b2"]
    w3, b3 = params["w3"], params["b3"]

    B, in_dim = x.shape
    hidden = w1.shape[1]
    num_classes = w3.shape[1]

    tb = _choose_tb(B, in_dim, hidden, num_classes)
    grid = (pl.cdiv(B, tb),)  # ragged B -> partial last block (rows independent)

    def resident(shape):
        # Constant index_map: block stays VMEM-resident across grid steps.
        return pl.BlockSpec(shape, lambda i: (0, 0))

    out = pl.pallas_call(
        mlp_kernel,
        out_shape=jax.ShapeDtypeStruct((B, num_classes), jnp.float32),
        grid=grid,
        in_specs=[
            pl.BlockSpec((tb, in_dim), lambda i: (i, 0)),   # x: tiled over batch
            resident((in_dim, hidden)),                     # w1
            resident((1, hidden)),                          # b1
            resident((hidden, LATENT_DIM)),                 # w2
            resident((1, LATENT_DIM)),                      # b2
            resident((LATENT_DIM, num_classes)),            # w3
            resident((1, num_classes)),                     # b3
        ],
        out_specs=pl.BlockSpec((tb, num_classes), lambda i: (i, 0)),
        compiler_params=pltpu.CompilerParams(
            dimension_semantics=("parallel",),
            vmem_limit_bytes=VMEM_LIMIT,
        ),
    )(x, w1, b1, w2, b2, w3, b3)

    return out


def init_params(key, in_dim, hidden_dim, num_classes):
    # Matches _initialize_weights: Linear weights ~ N(0, 0.01), biases = 0.
    k1, k2, k3 = jax.random.split(key, 3)
    std = 0.01
    return {
        # stored as (in, out) == PyTorch weight (out, in) transposed
        "w1": std * jax.random.normal(k1, (in_dim, hidden_dim), jnp.float32),
        "b1": jnp.zeros((1, hidden_dim), jnp.float32),
        "w2": std * jax.random.normal(k2, (hidden_dim, LATENT_DIM), jnp.float32),
        "b2": jnp.zeros((1, LATENT_DIM), jnp.float32),
        "w3": std * jax.random.normal(k3, (LATENT_DIM, num_classes), jnp.float32),
        "b3": jnp.zeros((1, num_classes), jnp.float32),
    }


def reference_forward(x, params):
    h1 = jnp.maximum(jnp.dot(x, params["w1"]) + params["b1"], 0.0)
    h2 = jnp.maximum(jnp.dot(h1, params["w2"]) + params["b2"], 0.0)
    return jnp.dot(h2, params["w3"]) + params["b3"]


if __name__ == "__main__":
    in_dim, hidden_dim, num_classes = 32, 32, 10
    key = jax.random.PRNGKey(0)
    kx, kp, kr = jax.random.split(key, 3)
    params = init_params(kp, in_dim, hidden_dim, num_classes)

    # Multi-step grid case (batch divisible by the tile).
    x = jax.random.normal(kx, (64, in_dim), jnp.float32)
    y = jax.block_until_ready(mlp_forward(x, params))
    y_ref = reference_forward(x, params)
    assert y.shape == (64, num_classes)
    assert jnp.allclose(y, y_ref, atol=1e-5, rtol=1e-3)

    # Ragged batch case (partial last block handled by Pallas masking).
    xr = jax.random.normal(kr, (13, in_dim), jnp.float32)
    yr = jax.block_until_ready(mlp_forward(xr, params))
    yr_ref = reference_forward(xr, params)
    assert yr.shape == (13, num_classes)
    assert jnp.allclose(yr, yr_ref, atol=1e-5, rtol=1e-3)

    print("KERNEL_OK")
</pallas_src>

<mosaic_0001>
module attributes {stable_mosaic.version = 11 : i64} {
  func.func @mlp_kernel(%arg0: i32, %arg1: memref<8x32xf32, #tpu.memory_space<vmem>>, %arg2: memref<32x32xf32, #tpu.memory_space<vmem>>, %arg3: memref<1x32xf32, #tpu.memory_space<vmem>>, %arg4: memref<32x16xf32, #tpu.memory_space<vmem>>, %arg5: memref<1x16xf32, #tpu.memory_space<vmem>>, %arg6: memref<16x10xf32, #tpu.memory_space<vmem>>, %arg7: memref<1x10xf32, #tpu.memory_space<vmem>>, %arg8: memref<8x10xf32, #tpu.memory_space<vmem>>) attributes {dimension_semantics = [#tpu.dimension_semantics<parallel>], iteration_bounds = array<i64: 8>, scalar_prefetch = 0 : i64, scratch_operands = 0 : i64, tpu.core_type = #tpu.core_type<tc>, window_params = [{transform_indices = @transform_0, window_bounds = array<i64: 8, 32>}, {pipeline_mode = #tpu.pipeline_mode<synchronous>, transform_indices = @transform_1, window_bounds = array<i64: 32, 32>}, {pipeline_mode = #tpu.pipeline_mode<synchronous>, transform_indices = @transform_2, window_bounds = array<i64: 1, 32>}, {pipeline_mode = #tpu.pipeline_mode<synchronous>, transform_indices = @transform_3, window_bounds = array<i64: 32, 16>}, {pipeline_mode = #tpu.pipeline_mode<synchronous>, transform_indices = @transform_4, window_bounds = array<i64: 1, 16>}, {pipeline_mode = #tpu.pipeline_mode<synchronous>, transform_indices = @transform_5, window_bounds = array<i64: 16, 10>}, {pipeline_mode = #tpu.pipeline_mode<synchronous>, transform_indices = @transform_6, window_bounds = array<i64: 1, 10>}, {transform_indices = @transform_7, window_bounds = array<i64: 8, 10>}]} {
    %c0 = arith.constant 0 : index
    %c0_0 = arith.constant 0 : index
    %0 = vector.load %arg1[%c0, %c0_0] : memref<8x32xf32, #tpu.memory_space<vmem>>, vector<8x32xf32>
    %c0_1 = arith.constant 0 : index
    %c0_2 = arith.constant 0 : index
    %1 = vector.load %arg2[%c0_1, %c0_2] : memref<32x32xf32, #tpu.memory_space<vmem>>, vector<32x32xf32>
    %cst = arith.constant dense<0.000000e+00> : vector<8x32xf32>
    %2 = tpu.matmul %0, %1, %cst {dimension_numbers = #tpu.dot_dimension_numbers<[1], [0], [0], [1], [0, 0, 1, 1], [], []>} : vector<8x32xf32>, vector<32x32xf32>, vector<8x32xf32> -> vector<8x32xf32>
    %c0_3 = arith.constant 0 : index
    %c0_4 = arith.constant 0 : index
    %3 = vector.load %arg3[%c0_3, %c0_4] : memref<1x32xf32, #tpu.memory_space<vmem>>, vector<1x32xf32>
    %4 = vector.broadcast %3 : vector<1x32xf32> to vector<8x32xf32>
    %5 = arith.addf %2, %4 : vector<8x32xf32>
    %cst_5 = arith.constant 0.000000e+00 : f32
    %6 = vector.broadcast %cst_5 : f32 to vector<8x32xf32>
    %7 = arith.maximumf %5, %6 : vector<8x32xf32>
    %c0_6 = arith.constant 0 : index
    %c0_7 = arith.constant 0 : index
    %8 = vector.load %arg4[%c0_6, %c0_7] : memref<32x16xf32, #tpu.memory_space<vmem>>, vector<32x16xf32>
    %cst_8 = arith.constant dense<0.000000e+00> : vector<8x16xf32>
    %9 = tpu.matmul %7, %8, %cst_8 {dimension_numbers = #tpu.dot_dimension_numbers<[1], [0], [0], [1], [0, 0, 1, 1], [], []>} : vector<8x32xf32>, vector<32x16xf32>, vector<8x16xf32> -> vector<8x16xf32>
    %c0_9 = arith.constant 0 : index
    %c0_10 = arith.constant 0 : index
    %10 = vector.load %arg5[%c0_9, %c0_10] : memref<1x16xf32, #tpu.memory_space<vmem>>, vector<1x16xf32>
    %11 = vector.broadcast %10 : vector<1x16xf32> to vector<8x16xf32>
    %12 = arith.addf %9, %11 : vector<8x16xf32>
    %cst_11 = arith.constant 0.000000e+00 : f32
    %13 = vector.broadcast %cst_11 : f32 to vector<8x16xf32>
    %14 = arith.maximumf %12, %13 : vector<8x16xf32>
    %c0_12 = arith.constant 0 : index
    %c0_13 = arith.constant 0 : index
    %15 = vector.load %arg6[%c0_12, %c0_13] : memref<16x10xf32, #tpu.memory_space<vmem>>, vector<16x10xf32>
    %cst_14 = arith.constant dense<0.000000e+00> : vector<8x10xf32>
    %16 = tpu.matmul %14, %15, %cst_14 {dimension_numbers = #tpu.dot_dimension_numbers<[1], [0], [0], [1], [0, 0, 1, 1], [], []>} : vector<8x16xf32>, vector<16x10xf32>, vector<8x10xf32> -> vector<8x10xf32>
    %c0_15 = arith.constant 0 : index
    %c0_16 = arith.constant 0 : index
    %17 = vector.load %arg7[%c0_15, %c0_16] : memref<1x10xf32, #tpu.memory_space<vmem>>, vector<1x10xf32>
    %18 = vector.broadcast %17 : vector<1x10xf32> to vector<8x10xf32>
    %19 = arith.addf %16, %18 : vector<8x10xf32>
    %c0_17 = arith.constant 0 : index
    %c0_18 = arith.constant 0 : index
    %20 = vector.load %arg8[%c0_17, %c0_18] : memref<8x10xf32, #tpu.memory_space<vmem>>, vector<8x10xf32>
    tpu.vector_store %arg8[%c0_17, %c0_18], %19 {strides = array<i32>} : memref<8x10xf32, #tpu.memory_space<vmem>>, vector<8x10xf32>,
    return
  }
  func.func @transform_0(%arg0: i32) -> (i32, i32) {
    %c0_i32 = arith.constant 0 : i32
    %c0_i32_0 = arith.constant 0 : i32
    return %arg0, %c0_i32 : i32, i32
  }
  func.func @transform_1(%arg0: i32) -> (i32, i32) {
    %c0_i32 = arith.constant 0 : i32
    %c0_i32_0 = arith.constant 0 : i32
    %c0_i32_1 = arith.constant 0 : i32
    return %c0_i32, %c0_i32_0 : i32, i32
  }
  func.func @transform_2(%arg0: i32) -> (i32, i32) {
    %c0_i32 = arith.constant 0 : i32
    %c0_i32_0 = arith.constant 0 : i32
    %c0_i32_1 = arith.constant 0 : i32
    return %c0_i32, %c0_i32_0 : i32, i32
  }
  func.func @transform_3(%arg0: i32) -> (i32, i32) {
    %c0_i32 = arith.constant 0 : i32
    %c0_i32_0 = arith.constant 0 : i32
    %c0_i32_1 = arith.constant 0 : i32
    return %c0_i32, %c0_i32_0 : i32, i32
  }
  func.func @transform_4(%arg0: i32) -> (i32, i32) {
    %c0_i32 = arith.constant 0 : i32
    %c0_i32_0 = arith.constant 0 : i32
    %c0_i32_1 = arith.constant 0 : i32
    return %c0_i32, %c0_i32_0 : i32, i32
  }
  func.func @transform_5(%arg0: i32) -> (i32, i32) {
    %c0_i32 = arith.constant 0 : i32
    %c0_i32_0 = arith.constant 0 : i32
    %c0_i32_1 = arith.constant 0 : i32
    return %c0_i32, %c0_i32_0 : i32, i32
  }
  func.func @transform_6(%arg0: i32) -> (i32, i32) {
    %c0_i32 = arith.constant 0 : i32
    %c0_i32_0 = arith.constant 0 : i32
    %c0_i32_1 = arith.constant 0 : i32
    return %c0_i32, %c0_i32_0 : i32, i32
  }
  func.func @transform_7(%arg0: i32) -> (i32, i32) {
    %c0_i32 = arith.constant 0 : i32
    %c0_i32_0 = arith.constant 0 : i32
    return %arg0, %c0_i32 : i32, i32
  }
}

</mosaic_0001>

<bundles_post_ra>
// kernel: tpu_custom_call.1
= control target key start
LH: loop header
LB: loop body
LE: loop exit
PB: predicated region body
PF: predicated region fallthrough
CT: control target
= control target key end

     0   :  { %s701_s24 = smov 0   ;;  %s769_s0 = inlined_call_operand.vmem [shape: f32[64,32], index: 0, kind: input, shape index: {}]   ;;  %s770_s1 = inlined_call_operand.vmem [shape: f32[32,32], index: 1, kind: input, shape index: {}]   ;;  %s771_s2 = inlined_call_operand.vmem [shape: f32[1,32], index: 2, kind: input, shape index: {}]   ;;  %s772_s3 = inlined_call_operand.vmem [shape: f32[32,16], index: 3, kind: input, shape index: {}]   ;;  %s773_s4 = inlined_call_operand.vmem [shape: f32[1,16], index: 4, kind: input, shape index: {}]   ;;  %s774_s5 = inlined_call_operand.vmem [shape: f32[16,10], index: 5, kind: input, shape index: {}]   ;;  %s775_s6 = inlined_call_operand.vmem [shape: f32[1,10], index: 6, kind: input, shape index: {}]   ;;  %s776_s7 = inlined_call_operand.vmem [shape: f32[64,10], index: 7, kind: output, shape index: {}]  }
   0x1 LB: > { %s584_s25 = sadd.s32 4294967295, %s657_s24   ;;  %p588_p0 = scmp.ge.s32.totalorder %s657_s24, 1  ;;  %s657_s24 = sphi %s701_s24, %s17_s24  }
   0x2   : > { %p236_p1 = scmp.lt.s32.totalorder %s657_s24, 9 }
   0x4   : > { %p237_p2 = pnand %p588_p0, %p236_p1 }
   0x5   : > { %p266_p3 = scmp.lt.s32.totalorder (!%p237_p2), %s584_s25, 7 }
   0x6   : > { %240 = sbr.rel (%p237_p2) target bundleno = 610 (0x262), region = 48 }
   0xb   : > { %v278_v0 = vld [vmem:[%s770_s1 + $0x18] sm:$0xff]  ;;  %v659_v1 = vmov 0.0   ;;  %v277_v2 = vld [vmem:[%s770_s1 + $0x10] sm:$0xff]  ;;  %vm660_vm0 = vmmov 0   ;;  %s778_s25 = smov (!%p266_p3, %s584_s25), 7  ;;  %v276_v4 = vld [vmem:[%s770_s1 + $0x8] sm:$0xff] }
   0xc   : > { %612 = vmatprep.subr.mxu0 %v659_v1  ;;  %620 = vmatprep.mubr.msk.f32.mxu0 %vm660_vm0, %v659_v1  ;;  %v364_v3 = vld [vmem:[%s772_s3 + $0x18] sm:$0xff]  ;;  %s589_s11 = sshll.u32 %s778_s25, 3  ;;  %v275_v5 = vld [vmem:[%s770_s1] sm:$0xff]  ;;  %vm286_vm1 = vcmask 261120   ;;  %v363_v7 = vld [vmem:[%s772_s3 + $0x10] sm:$0xff]  ;;  %vm455_vm2 = vcmask 130048  }
   0xd   : > { %613 = vmatpush3.msra.mxu0 %v278_v0  ;;  %623 = vmatprep.subr.mxu1 %v659_v1  ;;  %s269_s16 = scalar_lea.vmem %s769_s0, %s589_s11  ;;  %v362_v8 = vld [vmem:[%s772_s3 + $0x8] sm:$0xff]  ;;  %v361_v9 = vld [vmem:[%s772_s3] sm:$0xff]  ;;  %s273_s15 = scalar_lea.vmem %s776_s7, %s589_s11  ;;  %vm529_vm3 = vcmask 80896  }
   0xe   : > { %614 = vmatprep.subr.mxu0 %v659_v1  ;;  %624 = vmatpush3.msra.mxu1 %v364_v3  ;;  %v274_v6 = vld [vmem:[%s269_s16] sm:$0xff]  ;;  %v447_v15 = vld [vmem:[%s774_s5 + $0x8] sm:$0xff] }
   0xf   : > { %615 = vmatpush3.msra.mxu0 %v277_v2  ;;  %625 = vmatprep.subr.mxu1 %v659_v1  ;;  %v591_v10 = vld [vmem:[%s771_s2] ss:$0 sm:$0xff] }
  0x10   : > { %616 = vmatprep.subr.mxu0 %v659_v1  ;;  %631 = vmatprep.mubr.msk.f32.mxu1 %vm660_vm0, %v659_v1  ;;  %v446_v16 = vld [vmem:[%s774_s5] sm:$0xff] }
  0x11   : > { %617 = vmatpush3.msra.mxu0 %v276_v4  ;;  %626 = vmatpush3.msra.mxu1 %v363_v7  ;;  %v593_v17 = vld [vmem:[%s773_s4] ss:$0 sm:$0xff] }
  0x12   : > { %618 = vmatprep.subr.mxu0 %v659_v1  ;;  %627 = vmatprep.subr.mxu1 %v659_v1  ;;  %v595_v22 = vld [vmem:[%s775_s6] ss:$0 sm:$0xff] }
  0x13   : > { %619 = vmatpush3.msra.mxu0 %v275_v5  ;;  %628 = vmatpush3.msra.mxu1 %v362_v8 }
  0x14   : > { %621 = vmatmul.mubr.msk.f32.vlgmr.msra.gmra.mxu0 %vm286_vm1, %v274_v6  ;;  %634 = vmatprep.subr.mxu0 %v659_v1 }
  0x15   : > { %638 = vmatprep.mubr.msk.f32.mxu0 %vm660_vm0, %v659_v1  ;;  %629 = vmatprep.subr.mxu1 %v659_v1 }
  0x16   : > { %630 = vmatpush3.msra.mxu1 %v361_v9  ;;  %635 = vmatpush3.msra.mxu0 %v447_v15 }
  0x17   : > { %636 = vmatprep.subr.mxu0 %v659_v1 }
  0x18   : > { %637 = vmatpush3.msra.mxu0 %v446_v16 }
  0xd4   : > { %v356_v11 = vpop.f32.mrf.mxu0 }
  0xd5   : > { %v357_v12 = vadd.f32 %v591_v10, %v356_v11 }
  0xd6   : > { %v622_v13 = vpop.f32.mrf.mxu0 }
  0xd7   : > { %v360_v14 = vmax.f32 %v357_v12, 0.0 }
  0xd9   : > { %632 = vmatmul.mubr.msk.f32.vlgmr.msra.gmra.mxu1 %vm286_vm1, %v360_v14 }
 0x199   : > { %v441_v18 = vpop.f32.mrf.mxu1 }
 0x19a   : > { %v442_v19 = vadd.f32 %v593_v17, %v441_v18 }
 0x19b   : > { %v633_v20 = vpop.f32.mrf.mxu1 }
 0x19c   : > { %v445_v21 = vmax.f32 %v442_v19, 0.0 }
 0x19e   : > { %639 = vmatmul.mubr.msk.f32.vlgmr.msra.gmra.mxu0 %vm455_vm2, %v445_v21 }
 0x25e   : > { %v525_v23 = vpop.f32.mrf.mxu0 }
 0x25f   : > { %v526_v24 = vadd.f32 %v595_v22, %v525_v23 }
 0x260   : > { %v640_v25 = vpop.f32.mrf.mxu0 }
 0x261   : > { %530 = vst.msk [vmem:[%s273_s15] sm:$0xff] %vm529_vm3, %v526_v24 }
 0x262 PF: > { %s17_s24 = sadd.s32 1, %s657_s24  }
 0x263   : > { %p14_p4 = scmp.ge.s32.totalorder %s17_s24, 10  }
 0x265   :  { %16 = sbr.rel (!%p14_p4) target bundleno = 1 (0x1), region = 78 }

</bundles_post_ra>
